<compile_context>
chip_gen: v7x
topology: tpu7x:2x2x1
jax: 0.10.0
libtpu: 0.0.40
codegen_flags: <defaults>
</compile_context>

<pallas_src>
import jax
import jax.numpy as jnp
from jax.experimental import pallas as pl
from jax.experimental.pallas import tpu as pltpu


def _normalize_kernel(x_ref, scale_ref, bias_ref, o_ref):
    # x_ref / o_ref: (block_rows, L) VMEM tiles.
    # scale_ref / bias_ref: (block_rows, 1) VMEM tiles, broadcast over lanes.
    x = x_ref[...].astype(jnp.float32)
    o_ref[...] = (x * scale_ref[...] + bias_ref[...]).astype(o_ref.dtype)


def normalize_layer(x, means, sds):
    """Pallas implementation of NormalizeLayer.forward.

    x:     (N, C, H, W) float array
    means: (C,) float array
    sds:   (C,) float array
    """
    N, C, H, W = x.shape
    R = N * C          # rows (one row per (batch, channel) plane)
    L = H * W          # lane-dense flattened spatial axis

    # Per-channel constants kept in f32; fold divide into multiply-add.
    means_f32 = jnp.asarray(means, dtype=jnp.float32)
    sds_f32 = jnp.asarray(sds, dtype=jnp.float32)
    inv_sds = 1.0 / sds_f32
    bias = -means_f32 * inv_sds

    # Row r of the flattened (N*C, H*W) view corresponds to channel r % C.
    scale_rows = jnp.tile(inv_sds, (N,)).reshape(R, 1)
    bias_rows = jnp.tile(bias, (N,)).reshape(R, 1)

    x2 = x.reshape(R, L)

    # Block multiple rows per grid step; target ~2 MiB per input block so that
    # (in + out) x double-buffering stays well inside even v7x's scoped VMEM
    # limit while amortizing the ~0.35 us per-step pipeline overhead.
    itemsize = jnp.dtype(x.dtype).itemsize
    bytes_per_row = max(1, L * itemsize)
    target_block_bytes = 2 * 1024 * 1024
    block_rows = max(1, target_block_bytes // bytes_per_row)
    if block_rows >= R:
        block_rows = R                       # full extent: (8,128) rule satisfied
    else:
        block_rows = max(8, (block_rows // 8) * 8)   # keep sublane-aligned
        if block_rows >= R:
            block_rows = R
    grid_rows = pl.cdiv(R, block_rows)

    out2 = pl.pallas_call(
        _normalize_kernel,
        out_shape=jax.ShapeDtypeStruct((R, L), x.dtype),
        grid=(grid_rows,),
        in_specs=[
            pl.BlockSpec((block_rows, L), lambda i: (i, 0)),
            pl.BlockSpec((block_rows, 1), lambda i: (i, 0)),
            pl.BlockSpec((block_rows, 1), lambda i: (i, 0)),
        ],
        out_specs=pl.BlockSpec((block_rows, L), lambda i: (i, 0)),
        compiler_params=pltpu.CompilerParams(
            dimension_semantics=("parallel",),
        ),
    )(x2, scale_rows, bias_rows)

    return out2.reshape(N, C, H, W)


if __name__ == "__main__":
    key = jax.random.PRNGKey(0)
    N, C, H, W = 2, 4, 16, 16

    x = jax.random.normal(key, (N, C, H, W), dtype=jnp.float32)

    # Deterministic "dataset" channel statistics (module __init__ takes lists).
    means = jnp.array([0.485, 0.456, 0.406, 0.5], dtype=jnp.float32)
    sds = jnp.array([0.229, 0.224, 0.225, 0.25], dtype=jnp.float32)

    out = normalize_layer(x, means, sds)
    out = jax.block_until_ready(out)

    # Reference check against plain-JAX computation of the same forward pass.
    ref = (x - means[None, :, None, None]) / sds[None, :, None, None]
    assert out.shape == (N, C, H, W)
    assert jnp.allclose(out, ref, atol=1e-5, rtol=1e-5)

    print("KERNEL_OK")
</pallas_src>

<mosaic_0001>
module attributes {stable_mosaic.version = 11 : i64} {
  func.func @_normalize_kernel(%arg0: i32, %arg1: memref<8x256xf32, #tpu.memory_space<vmem>>, %arg2: memref<8x1xf32, #tpu.memory_space<vmem>>, %arg3: memref<8x1xf32, #tpu.memory_space<vmem>>, %arg4: memref<8x256xf32, #tpu.memory_space<vmem>>) attributes {dimension_semantics = [#tpu.dimension_semantics<parallel>], iteration_bounds = array<i64: 1>, scalar_prefetch = 0 : i64, scratch_operands = 0 : i64, tpu.core_type = #tpu.core_type<tc>, window_params = [{transform_indices = @transform_0, window_bounds = array<i64: 8, 256>}, {transform_indices = @transform_1, window_bounds = array<i64: 8, 1>}, {transform_indices = @transform_2, window_bounds = array<i64: 8, 1>}, {transform_indices = @transform_3, window_bounds = array<i64: 8, 256>}]} {
    %c0 = arith.constant 0 : index
    %c0_0 = arith.constant 0 : index
    %0 = vector.load %arg1[%c0, %c0_0] : memref<8x256xf32, #tpu.memory_space<vmem>>, vector<8x256xf32>
    %c0_1 = arith.constant 0 : index
    %c0_2 = arith.constant 0 : index
    %1 = vector.load %arg2[%c0_1, %c0_2] : memref<8x1xf32, #tpu.memory_space<vmem>>, vector<8x1xf32>
    %2 = vector.broadcast %1 : vector<8x1xf32> to vector<8x256xf32>
    %3 = arith.mulf %0, %2 : vector<8x256xf32>
    %c0_3 = arith.constant 0 : index
    %c0_4 = arith.constant 0 : index
    %4 = vector.load %arg3[%c0_3, %c0_4] : memref<8x1xf32, #tpu.memory_space<vmem>>, vector<8x1xf32>
    %5 = vector.broadcast %4 : vector<8x1xf32> to vector<8x256xf32>
    %6 = arith.addf %3, %5 : vector<8x256xf32>
    %c0_5 = arith.constant 0 : index
    %c0_6 = arith.constant 0 : index
    %7 = vector.load %arg4[%c0_5, %c0_6] : memref<8x256xf32, #tpu.memory_space<vmem>>, vector<8x256xf32>
    tpu.vector_store %arg4[%c0_5, %c0_6], %6 {strides = array<i32>} : memref<8x256xf32, #tpu.memory_space<vmem>>, vector<8x256xf32>,
    return
  }
  func.func @transform_0(%arg0: i32) -> (i32, i32) {
    %c0_i32 = arith.constant 0 : i32
    %c0_i32_0 = arith.constant 0 : i32
    return %arg0, %c0_i32 : i32, i32
  }
  func.func @transform_1(%arg0: i32) -> (i32, i32) {
    %c0_i32 = arith.constant 0 : i32
    %c0_i32_0 = arith.constant 0 : i32
    return %arg0, %c0_i32 : i32, i32
  }
  func.func @transform_2(%arg0: i32) -> (i32, i32) {
    %c0_i32 = arith.constant 0 : i32
    %c0_i32_0 = arith.constant 0 : i32
    return %arg0, %c0_i32 : i32, i32
  }
  func.func @transform_3(%arg0: i32) -> (i32, i32) {
    %c0_i32 = arith.constant 0 : i32
    %c0_i32_0 = arith.constant 0 : i32
    return %arg0, %c0_i32 : i32, i32
  }
}

</mosaic_0001>

<bundles_post_ra>
// kernel: tpu_custom_call.1
= control target key start
LH: loop header
LB: loop body
LE: loop exit
PB: predicated region body
PF: predicated region fallthrough
CT: control target
= control target key end

     0   :  { %s122_s0 = inlined_call_operand.vmem [shape: f32[8,256], index: 0, kind: input, shape index: {}]   ;;  %s123_s1 = inlined_call_operand.vmem [shape: f32[8,1], index: 1, kind: input, shape index: {}]   ;;  %s124_s2 = inlined_call_operand.vmem [shape: f32[8,1], index: 2, kind: input, shape index: {}]   ;;  %s125_s3 = inlined_call_operand.hbm [shape: f32[8,256], index: 3, kind: output, shape index: {}]  }
   0x1   :  { %v17_v0 = vld [vmem:[%s123_s1] sm:$0xff] }
   0x2   :  { %8 = vsyncpa [#allocation3], 0  ;;  %v76_v1 = vmov 0   ;;  %v25_v2 = vld [vmem:[%s124_s2] sm:$0xff]  ;;  %v16_v5 = vld [vmem:[%s122_s0 + $0x8] sm:$0xff]  ;;  %s77_s20 = smov [#allocation2]  }
   0x3   :  { %51 = vset.pattern.permute.xlu0 %v76_v1  ;;  %v15_v4 = vld [vmem:[%s122_s0] sm:$0xff]  ;;  %s41_s1 = sshll.u32 %s77_s20, 4  ;;  %s42_s1 = int_to_ptr.vmem [resolvable:$true] %s41_s1 }
   0x4   :  { %20 = vperm.xlu0 %51, %v17_v0   ;;  %s52_s2 = scalar_lea.vmem %s42_s1, 256  ;;  %p57_p1 = scmp.lt.s32.totalorder %s42_s1, %s42_s1 }
   0x5   :  { %p53_p0 = scmp.ne.s32.totalorder %s42_s1, %s52_s2  ;;  %p58_p2 = scmp.lt.s32.totalorder %s52_s2, %s52_s2 }
   0x7   :  { %p59_p3 = por %p58_p2, %p57_p1 }
   0x8   :  { %28 = vperm.xlu0 %51, %v25_v2  }
   0x9   :  { %p60_p4 = pnand %p59_p3, %p53_p0 }
  0x83   :  { %v21_v3 = vpop.permute.xlu0 %20 }
  0x84   :  { %v23_v6 = vmul.f32 %v21_v3, %v15_v4  ;;  %v24_v7 = vmul.f32 %v21_v3, %v16_v5 }
  0x87   :  { %v29_v8 = vpop.permute.xlu0 %28 }
  0x88   :  { %v31_v9 = vadd.f32 %v29_v8, %v23_v6  ;;  %v32_v10 = vadd.f32 %v29_v8, %v24_v7 }
  0x8a   :  { %33 = vst [vmem:[#allocation2] sm:$0xff] %v31_v9  ;;  %34 = vst [vmem:[#allocation2 + $0x8] sm:$0xff] %v32_v10 }
  0x8b   :  { %63 = shalt.err (!%p60_p4)
}
  0x8c   :  { %s64_s0 = scalar_lea.hbm %s125_s3, 256 }
  0x8d   :  { %p65_p5 = scmp.ne.s32.totalorder %s125_s3, %s64_s0  ;;  %p68_p6 = scmp.lt.u32.totalorder %s64_s0, %s125_s3 }
  0x8f   :  { %p70_p7 = pnand %p68_p6, %p65_p5 }
  0x91   :  { %73 = shalt.err (!%p70_p7)
}
  0x92   :  { %44 = dma.vmem_to_hbm [thread:$0]  %s42_s1, 256, %s125_s3, [#allocation3]  }
  0x93   :  { %74 = dma.done.wait [#allocation3], 256  }
  0x94   :  { %75 = vsyncadd [#allocation3], 4294967040 }
  0x95   :  { %48 = vsyncpa [#allocation3], 1 }

</bundles_post_ra>
